<compile_context>
chip_gen: v5e
topology: v5e:2x2
jax: 0.10.0
libtpu: 0.0.40
codegen_flags: <defaults>
</compile_context>

<pallas_src>
import math
import functools

import jax
import jax.numpy as jnp
import numpy as np
from jax import lax
from jax.experimental import pallas as pl
from jax.experimental.pallas import tpu as pltpu


def _round_up(n, m):
    return (n + m - 1) // m * m


# ---------------------------------------------------------------------------
# Kernel 1: K/V projections — computed once per call, head-major outputs.
# grid = (n_heads,); each step emits K_h / V_h of shape (1, B, Lkv_pad, dh).
# ---------------------------------------------------------------------------
def _kv_proj_kernel(y_ref, wk_ref, bk_ref, wv_ref, bv_ref, k_ref, v_ref):
    batch, l_kv, d_cross = y_ref.shape
    d_head = wk_ref.shape[-1]
    n_kv = batch * l_kv

    yf = y_ref[...].reshape(n_kv, d_cross)
    k = jnp.dot(yf, wk_ref[0], preferred_element_type=jnp.float32) + bk_ref[0]
    v = jnp.dot(yf, wv_ref[0], preferred_element_type=jnp.float32) + bv_ref[0]
    k_ref[...] = k.reshape(1, batch, l_kv, d_head).astype(k_ref.dtype)
    v_ref[...] = v.reshape(1, batch, l_kv, d_head).astype(v_ref.dtype)


# ---------------------------------------------------------------------------
# Kernel 2: attention.  grid = (Lq_tiles, n_heads), ("parallel", "arbitrary").
# One Lq tile x one head per step; head contributions to the output
# projection are summed in a persistent f32 VMEM accumulator.
# ---------------------------------------------------------------------------
def _attn_kernel(x_ref, k_ref, v_ref, wq_ref, bq_ref, wo_ref, bo_ref,
                 o_ref, acc_ref, *, l_kv, attn_dtype):
    h = pl.program_id(1)
    n_heads = pl.num_programs(1)
    batch, tile_q, d_embed = x_ref.shape
    l_kv_pad, d_head = k_ref.shape[2], k_ref.shape[3]
    n_q = batch * tile_q

    @pl.when(h == 0)
    def _():
        acc_ref[...] = jnp.zeros_like(acc_ref)

    # Per-head Q projection (1/sqrt(d_head) already folded into Wq/bq).
    xf = x_ref[...].reshape(n_q, d_embed)
    q = jnp.dot(xf, wq_ref[0], preferred_element_type=jnp.float32) + bq_ref[0]
    q3 = q.reshape(batch, tile_q, d_head)

    # Attention matmuls with (optionally bf16) MXU operands; f32 accumulation.
    # Contract last dims directly — no explicit K transpose.
    qm = q3.astype(attn_dtype)
    km = k_ref[0].astype(attn_dtype)
    s = jnp.einsum("bqd,bkd->bqk", qm, km,
                   preferred_element_type=jnp.float32)       # (B, tq, Lkv_pad)

    if l_kv_pad != l_kv:                                     # mask padded KV cols
        col = lax.broadcasted_iota(jnp.int32, s.shape, 2)
        s = jnp.where(col < l_kv, s, -jnp.inf)

    # Softmax in f32; divide replaced by EUP approximate reciprocal.
    m = jnp.max(s, axis=-1, keepdims=True)
    e = jnp.exp(s - m)
    denom = jnp.sum(e, axis=-1, keepdims=True)
    p = e * pl.reciprocal(denom, approx=True)

    vm = v_ref[0].astype(attn_dtype)
    o3 = jnp.einsum("bqk,bkd->bqd", p.astype(attn_dtype), vm,
                    preferred_element_type=jnp.float32)      # (B, tq, d_head)

    # This head's contribution to the output projection (concat-free).
    contrib = jnp.dot(o3.reshape(n_q, d_head).astype(attn_dtype), wo_ref[0],
                      preferred_element_type=jnp.float32)    # (n_q, D)
    acc_ref[...] += contrib

    @pl.when(h == n_heads - 1)
    def _():
        out = acc_ref[...] + bo_ref[...]
        o_ref[...] = out.reshape(batch, tile_q, d_embed).astype(o_ref.dtype)


# ---------------------------------------------------------------------------
# Wrapper
# ---------------------------------------------------------------------------
def _vmem_capacity_bytes():
    try:
        info = pltpu.get_tpu_info()
        cap = int(getattr(info, "vmem_capacity_bytes", 0) or 0)
        if cap > 0:
            return cap
    except Exception:
        pass
    return 128 * 1024 * 1024            # v5e/v6e default


def _pick_q_tile(l_q, cap_rows):
    """Largest Lq tile (multiple of 8, <= cap_rows); Lq gets padded to it."""
    cap_rows = max(8, cap_rows - cap_rows % 8)
    l8 = _round_up(l_q, 8)
    if l8 <= cap_rows:
        return l8
    for t in range(cap_rows, 7, -8):
        if l8 % t == 0:
            return t
    return cap_rows                      # no clean divisor: pad Lq up to cap


def cross_attention(x, y, params, *, n_heads, compute_dtype=None):
    """x: (B, Lq, d_embed)   y: (B, Lkv, d_cross)   ->   (B, Lq, d_embed).

    compute_dtype=jnp.bfloat16 is recommended on v6e/v7x (native MXU dtype,
    half the weight/KV bytes); softmax and accumulation stay f32 regardless.
    """
    B, Lq, d_embed = x.shape
    _, Lkv, d_cross = y.shape
    assert d_embed % n_heads == 0
    d_head = d_embed // n_heads
    out_dtype = x.dtype
    scale = 1.0 / math.sqrt(d_head)

    w_dtype = compute_dtype if compute_dtype is not None else jnp.float32
    attn_dtype = w_dtype
    kv_dtype = w_dtype

    # PyTorch Linear stores weight as (out, in); pre-transpose to (in, out)
    # and split the output-feature axis head-major so the kernels never
    # lane-slice.  1/sqrt(d_head) is folded into Wq / bq here.
    wq3 = (params["wq"].T.reshape(d_embed, n_heads, d_head)
           .transpose(1, 0, 2) * scale).astype(w_dtype)            # (H, D, dh)
    wk3 = (params["wk"].T.reshape(d_cross, n_heads, d_head)
           .transpose(1, 0, 2)).astype(w_dtype)                    # (H, Dc, dh)
    wv3 = (params["wv"].T.reshape(d_cross, n_heads, d_head)
           .transpose(1, 0, 2)).astype(w_dtype)                    # (H, Dc, dh)
    wo3 = params["wo"].T.reshape(n_heads, d_head, d_embed).astype(w_dtype)
    bq3 = (params["bq"].reshape(n_heads, 1, d_head) * scale).astype(jnp.float32)
    bk3 = params["bk"].reshape(n_heads, 1, d_head).astype(jnp.float32)
    bv3 = params["bv"].reshape(n_heads, 1, d_head).astype(jnp.float32)
    bo2 = params["bo"].reshape(1, d_embed).astype(jnp.float32)

    xm = x.astype(w_dtype)
    ym = y.astype(w_dtype)

    # Pad Lkv to a multiple of 8 (padded columns are masked in-kernel).
    Lkv_pad = _round_up(Lkv, 8)
    if Lkv_pad != Lkv:
        ym = jnp.pad(ym, ((0, 0), (0, Lkv_pad - Lkv), (0, 0)))

    # Generation-aware Lq tile: 1024 cap on 128 MiB chips (v5e/v6e), 256 on
    # 64 MiB v7x.  Lq is padded to a multiple of the tile; no huge fallback.
    vmem_cap = _vmem_capacity_bytes()
    tq_cap = 1024 if vmem_cap >= 96 * 1024 * 1024 else 256
    tq = _pick_q_tile(Lq, tq_cap)
    Lq_pad = _round_up(Lq, tq)
    if Lq_pad != Lq:
        xm = jnp.pad(xm, ((0, 0), (0, Lq_pad - Lq), (0, 0)))

    # ---------------- K/V projections: once per call ----------------
    kv_shape = jax.ShapeDtypeStruct((n_heads, B, Lkv_pad, d_head), kv_dtype)
    k3, v3 = pl.pallas_call(
        _kv_proj_kernel,
        out_shape=(kv_shape, kv_shape),
        grid_spec=pltpu.PrefetchScalarGridSpec(
            num_scalar_prefetch=0,
            grid=(n_heads,),
            in_specs=[
                pl.BlockSpec((B, Lkv_pad, d_cross), lambda h: (0, 0, 0)),   # y
                pl.BlockSpec((1, d_cross, d_head), lambda h: (h, 0, 0)),    # Wk_h
                pl.BlockSpec((1, 1, d_head), lambda h: (h, 0, 0)),          # bk_h
                pl.BlockSpec((1, d_cross, d_head), lambda h: (h, 0, 0)),    # Wv_h
                pl.BlockSpec((1, 1, d_head), lambda h: (h, 0, 0)),          # bv_h
            ],
            out_specs=[
                pl.BlockSpec((1, B, Lkv_pad, d_head), lambda h: (h, 0, 0, 0)),
                pl.BlockSpec((1, B, Lkv_pad, d_head), lambda h: (h, 0, 0, 0)),
            ],
        ),
        compiler_params=pltpu.CompilerParams(
            dimension_semantics=("parallel",)),
    )(ym, wk3, bk3, wv3, bv3)

    # ---------------- attention over (Lq tiles, heads) ----------------
    n_q = B * tq
    grid = (Lq_pad // tq, n_heads)

    kernel = functools.partial(_attn_kernel, l_kv=Lkv, attn_dtype=attn_dtype)

    # vmem_limit sized from the actual per-step resident set (+headroom),
    # clamped to 90% of the chip's physical VMEM.
    w_isz = jnp.dtype(w_dtype).itemsize
    x_tile_b = B * tq * d_embed * jnp.dtype(xm.dtype).itemsize
    out_tile_b = B * tq * d_embed * jnp.dtype(out_dtype).itemsize
    kv_tile_b = 2 * B * Lkv_pad * d_head * jnp.dtype(kv_dtype).itemsize
    w_tile_b = 2 * d_embed * d_head * w_isz + (d_head + d_embed) * 4
    acc_b = n_q * d_embed * 4
    tmp_b = 3 * B * tq * Lkv_pad * 4 + 2 * n_q * max(d_head, d_embed) * 4
    est = 2 * (x_tile_b + out_tile_b + kv_tile_b + w_tile_b) + acc_b + tmp_b
    vmem_limit = int(min(max(2 * est + (8 << 20), 32 << 20),
                         vmem_cap * 9 // 10))

    flops = 2 * (B * Lq_pad * d_embed * d_embed            # Q proj (all heads)
                 + 2 * B * Lq_pad * Lkv_pad * d_embed      # QK^T + PV
                 + B * Lq_pad * d_embed * d_embed)         # out proj
    bytes_accessed = int(xm.size * jnp.dtype(xm.dtype).itemsize
                         + k3.size * jnp.dtype(k3.dtype).itemsize
                         + v3.size * jnp.dtype(v3.dtype).itemsize
                         + (wq3.size + wo3.size) * w_isz
                         + B * Lq_pad * d_embed * jnp.dtype(out_dtype).itemsize)
    cost = pl.CostEstimate(flops=int(flops),
                           transcendentals=int(B * n_heads * Lq_pad * Lkv_pad),
                           bytes_accessed=bytes_accessed)

    out_pad = pl.pallas_call(
        kernel,
        out_shape=jax.ShapeDtypeStruct((B, Lq_pad, d_embed), out_dtype),
        grid_spec=pltpu.PrefetchScalarGridSpec(
            num_scalar_prefetch=0,
            grid=grid,
            in_specs=[
                pl.BlockSpec((B, tq, d_embed), lambda i, h: (0, i, 0)),          # x tile
                pl.BlockSpec((1, B, Lkv_pad, d_head), lambda i, h: (h, 0, 0, 0)),  # K_h
                pl.BlockSpec((1, B, Lkv_pad, d_head), lambda i, h: (h, 0, 0, 0)),  # V_h
                pl.BlockSpec((1, d_embed, d_head), lambda i, h: (h, 0, 0)),        # Wq_h
                pl.BlockSpec((1, 1, d_head), lambda i, h: (h, 0, 0)),              # bq_h
                pl.BlockSpec((1, d_head, d_embed), lambda i, h: (h, 0, 0)),        # Wo_h
                pl.BlockSpec((1, d_embed), lambda i, h: (0, 0)),                   # bo
            ],
            out_specs=pl.BlockSpec((B, tq, d_embed), lambda i, h: (0, i, 0)),
            scratch_shapes=[pltpu.VMEM((n_q, d_embed), jnp.float32)],
        ),
        compiler_params=pltpu.CompilerParams(
            dimension_semantics=("parallel", "arbitrary"),   # Lq tiles || , heads = reduction
            vmem_limit_bytes=vmem_limit),
        cost_estimate=cost,
    )(xm, k3, v3, wq3, bq3, wo3, bo2)

    if Lq_pad != Lq:
        out_pad = out_pad[:, :Lq, :]
    return out_pad


def _reference(x, y, params, *, n_heads):
    B, Lq, d_embed = x.shape
    d_head = d_embed // n_heads
    q = x @ params["wq"].T + params["bq"]
    k = y @ params["wk"].T + params["bk"]
    v = y @ params["wv"].T + params["bv"]
    q = q.reshape(B, -1, n_heads, d_head).transpose(0, 2, 1, 3)
    k = k.reshape(B, -1, n_heads, d_head).transpose(0, 2, 1, 3)
    v = v.reshape(B, -1, n_heads, d_head).transpose(0, 2, 1, 3)
    w = (q @ jnp.swapaxes(k, -1, -2)) / math.sqrt(d_head)
    w = jax.nn.softmax(w, axis=-1)
    out = (w @ v).transpose(0, 2, 1, 3).reshape(B, Lq, d_embed)
    return out @ params["wo"].T + params["bo"]


if __name__ == "__main__":
    # Small, module-consistent shapes.
    B, Lq, Lkv = 2, 16, 8
    n_heads, d_embed, d_cross = 4, 32, 24

    key = jax.random.PRNGKey(0)
    keys = jax.random.split(key, 10)

    x = jax.random.normal(keys[0], (B, Lq, d_embed), dtype=jnp.float32)
    y = jax.random.normal(keys[1], (B, Lkv, d_cross), dtype=jnp.float32)

    # Deterministic parameter init (PyTorch Linear shapes: W=(out,in), b=(out,)).
    def init_linear(kw, kb, out_f, in_f):
        bound = 1.0 / math.sqrt(in_f)
        w = jax.random.uniform(kw, (out_f, in_f), jnp.float32, -bound, bound)
        b = jax.random.uniform(kb, (out_f,), jnp.float32, -bound, bound)
        return w, b

    wq, bq = init_linear(keys[2], keys[3], d_embed, d_embed)
    wk, bk = init_linear(keys[4], keys[5], d_embed, d_cross)
    wv, bv = init_linear(keys[6], keys[7], d_embed, d_cross)
    wo, bo = init_linear(keys[8], keys[9], d_embed, d_embed)

    params = dict(wq=wq, bq=bq, wk=wk, bk=bk, wv=wv, bv=bv, wo=wo, bo=bo)

    ref = _reference(x, y, params, n_heads=n_heads)

    # Default f32 path — tolerance only accounts for the EUP approx reciprocal.
    out = jax.block_until_ready(cross_attention(x, y, params, n_heads=n_heads))
    np.testing.assert_allclose(np.asarray(out), np.asarray(ref),
                               rtol=5e-3, atol=5e-3)

    # bf16 MXU path (recommended on v6e/v7x) — looser tolerance for bf16 rounding.
    out_bf16 = jax.block_until_ready(
        cross_attention(x, y, params, n_heads=n_heads,
                        compute_dtype=jnp.bfloat16))
    np.testing.assert_allclose(np.asarray(out_bf16), np.asarray(ref),
                               rtol=5e-2, atol=5e-2)

    print("KERNEL_OK")
</pallas_src>

<mosaic_0001>
module attributes {stable_mosaic.version = 11 : i64} {
  func.func @_kv_proj_kernel(%arg0: i32, %arg1: memref<2x8x24xf32, #tpu.memory_space<vmem>>, %arg2: memref<1x24x8xf32, #tpu.memory_space<vmem>>, %arg3: memref<1x1x8xf32, #tpu.memory_space<vmem>>, %arg4: memref<1x24x8xf32, #tpu.memory_space<vmem>>, %arg5: memref<1x1x8xf32, #tpu.memory_space<vmem>>, %arg6: memref<1x2x8x8xf32, #tpu.memory_space<vmem>>, %arg7: memref<1x2x8x8xf32, #tpu.memory_space<vmem>>) attributes {dimension_semantics = [#tpu.dimension_semantics<parallel>], iteration_bounds = array<i64: 4>, scalar_prefetch = 0 : i64, scratch_operands = 0 : i64, tpu.core_type = #tpu.core_type<tc>, window_params = [{pipeline_mode = #tpu.pipeline_mode<synchronous>, transform_indices = @transform_0, window_bounds = array<i64: 2, 8, 24>}, {transform_indices = @transform_1, window_bounds = array<i64: 1, 24, 8>}, {transform_indices = @transform_2, window_bounds = array<i64: 1, 1, 8>}, {transform_indices = @transform_3, window_bounds = array<i64: 1, 24, 8>}, {transform_indices = @transform_4, window_bounds = array<i64: 1, 1, 8>}, {transform_indices = @transform_5, window_bounds = array<i64: 1, 2, 8, 8>}, {transform_indices = @transform_6, window_bounds = array<i64: 1, 2, 8, 8>}]} {
    %c0 = arith.constant 0 : index
    %c0_0 = arith.constant 0 : index
    %c0_1 = arith.constant 0 : index
    %0 = vector.load %arg1[%c0, %c0_0, %c0_1] : memref<2x8x24xf32, #tpu.memory_space<vmem>>, vector<2x8x24xf32>
    %1 = vector.shape_cast %0 : vector<2x8x24xf32> to vector<16x24xf32>
    %c0_2 = arith.constant 0 : index
    %c0_3 = arith.constant 0 : index
    %c0_4 = arith.constant 0 : index
    %2 = vector.load %arg2[%c0_2, %c0_3, %c0_4] : memref<1x24x8xf32, #tpu.memory_space<vmem>>, vector<1x24x8xf32>
    %3 = vector.shape_cast %2 : vector<1x24x8xf32> to vector<24x8xf32>
    %cst = arith.constant dense<0.000000e+00> : vector<16x8xf32>
    %4 = tpu.matmul %1, %3, %cst {dimension_numbers = #tpu.dot_dimension_numbers<[1], [0], [0], [1], [0, 0, 1, 1], [], []>} : vector<16x24xf32>, vector<24x8xf32>, vector<16x8xf32> -> vector<16x8xf32>
    %c0_5 = arith.constant 0 : index
    %c0_6 = arith.constant 0 : index
    %c0_7 = arith.constant 0 : index
    %5 = vector.load %arg3[%c0_5, %c0_6, %c0_7] : memref<1x1x8xf32, #tpu.memory_space<vmem>>, vector<1x1x8xf32>
    %6 = vector.shape_cast %5 : vector<1x1x8xf32> to vector<1x8xf32>
    %7 = vector.broadcast %6 : vector<1x8xf32> to vector<16x8xf32>
    %8 = arith.addf %4, %7 : vector<16x8xf32>
    %c0_8 = arith.constant 0 : index
    %c0_9 = arith.constant 0 : index
    %c0_10 = arith.constant 0 : index
    %9 = vector.load %arg4[%c0_8, %c0_9, %c0_10] : memref<1x24x8xf32, #tpu.memory_space<vmem>>, vector<1x24x8xf32>
    %10 = vector.shape_cast %9 : vector<1x24x8xf32> to vector<24x8xf32>
    %cst_11 = arith.constant dense<0.000000e+00> : vector<16x8xf32>
    %11 = tpu.matmul %1, %10, %cst_11 {dimension_numbers = #tpu.dot_dimension_numbers<[1], [0], [0], [1], [0, 0, 1, 1], [], []>} : vector<16x24xf32>, vector<24x8xf32>, vector<16x8xf32> -> vector<16x8xf32>
    %c0_12 = arith.constant 0 : index
    %c0_13 = arith.constant 0 : index
    %c0_14 = arith.constant 0 : index
    %12 = vector.load %arg5[%c0_12, %c0_13, %c0_14] : memref<1x1x8xf32, #tpu.memory_space<vmem>>, vector<1x1x8xf32>
    %13 = vector.shape_cast %12 : vector<1x1x8xf32> to vector<1x8xf32>
    %14 = vector.broadcast %13 : vector<1x8xf32> to vector<16x8xf32>
    %15 = arith.addf %11, %14 : vector<16x8xf32>
    %16 = vector.shape_cast %8 : vector<16x8xf32> to vector<1x2x8x8xf32>
    %c0_15 = arith.constant 0 : index
    %c0_16 = arith.constant 0 : index
    %c0_17 = arith.constant 0 : index
    %c0_18 = arith.constant 0 : index
    %17 = vector.load %arg6[%c0_15, %c0_16, %c0_17, %c0_18] : memref<1x2x8x8xf32, #tpu.memory_space<vmem>>, vector<1x2x8x8xf32>
    tpu.vector_store %arg6[%c0_15, %c0_16, %c0_17, %c0_18], %16 {strides = array<i32>} : memref<1x2x8x8xf32, #tpu.memory_space<vmem>>, vector<1x2x8x8xf32>,
    %18 = vector.shape_cast %15 : vector<16x8xf32> to vector<1x2x8x8xf32>
    %c0_19 = arith.constant 0 : index
    %c0_20 = arith.constant 0 : index
    %c0_21 = arith.constant 0 : index
    %c0_22 = arith.constant 0 : index
    %19 = vector.load %arg7[%c0_19, %c0_20, %c0_21, %c0_22] : memref<1x2x8x8xf32, #tpu.memory_space<vmem>>, vector<1x2x8x8xf32>
    tpu.vector_store %arg7[%c0_19, %c0_20, %c0_21, %c0_22], %18 {strides = array<i32>} : memref<1x2x8x8xf32, #tpu.memory_space<vmem>>, vector<1x2x8x8xf32>,
    return
  }
  func.func @transform_0(%arg0: i32) -> (i32, i32, i32) {
    %c0_i32 = arith.constant 0 : i32
    %c0_i32_0 = arith.constant 0 : i32
    %c0_i32_1 = arith.constant 0 : i32
    %c0_i32_2 = arith.constant 0 : i32
    return %c0_i32, %c0_i32_0, %c0_i32_1 : i32, i32, i32
  }
  func.func @transform_1(%arg0: i32) -> (i32, i32, i32) {
    %c0_i32 = arith.constant 0 : i32
    %c0_i32_0 = arith.constant 0 : i32
    %c0_i32_1 = arith.constant 0 : i32
    return %arg0, %c0_i32, %c0_i32_0 : i32, i32, i32
  }
  func.func @transform_2(%arg0: i32) -> (i32, i32, i32) {
    %c0_i32 = arith.constant 0 : i32
    %c0_i32_0 = arith.constant 0 : i32
    %c0_i32_1 = arith.constant 0 : i32
    return %arg0, %c0_i32, %c0_i32_0 : i32, i32, i32
  }
  func.func @transform_3(%arg0: i32) -> (i32, i32, i32) {
    %c0_i32 = arith.constant 0 : i32
    %c0_i32_0 = arith.constant 0 : i32
    %c0_i32_1 = arith.constant 0 : i32
    return %arg0, %c0_i32, %c0_i32_0 : i32, i32, i32
  }
  func.func @transform_4(%arg0: i32) -> (i32, i32, i32) {
    %c0_i32 = arith.constant 0 : i32
    %c0_i32_0 = arith.constant 0 : i32
    %c0_i32_1 = arith.constant 0 : i32
    return %arg0, %c0_i32, %c0_i32_0 : i32, i32, i32
  }
  func.func @transform_5(%arg0: i32) -> (i32, i32, i32, i32) {
    %c0_i32 = arith.constant 0 : i32
    %c0_i32_0 = arith.constant 0 : i32
    %c0_i32_1 = arith.constant 0 : i32
    %c0_i32_2 = arith.constant 0 : i32
    return %arg0, %c0_i32, %c0_i32_0, %c0_i32_1 : i32, i32, i32, i32
  }
  func.func @transform_6(%arg0: i32) -> (i32, i32, i32, i32) {
    %c0_i32 = arith.constant 0 : i32
    %c0_i32_0 = arith.constant 0 : i32
    %c0_i32_1 = arith.constant 0 : i32
    %c0_i32_2 = arith.constant 0 : i32
    return %arg0, %c0_i32, %c0_i32_0, %c0_i32_1 : i32, i32, i32, i32
  }
}

</mosaic_0001>

<bundles_post_ra>
// kernel: tpu_custom_call.1
= control target key start
LH: loop header
LB: loop body
LE: loop exit
PB: predicated region body
PF: predicated region fallthrough
CT: control target
= control target key end

     0   :  { %s898_s0 = inlined_call_operand.vmem [shape: f32[2,8,24], index: 0, kind: input, shape index: {}]   ;;  %s899_s1 = inlined_call_operand.vmem [shape: f32[4,24,8], index: 1, kind: input, shape index: {}]   ;;  %s900_s2 = inlined_call_operand.vmem [shape: f32[4,1,8], index: 2, kind: input, shape index: {}]   ;;  %s901_s3 = inlined_call_operand.vmem [shape: f32[4,24,8], index: 3, kind: input, shape index: {}]   ;;  %s902_s4 = inlined_call_operand.vmem [shape: f32[4,1,8], index: 4, kind: input, shape index: {}]   ;;  %s903_s5 = inlined_call_operand.hbm [shape: f32[4,2,8,8], index: 5, kind: output, shape index: {0}]   ;;  %s904_s6 = inlined_call_operand.hbm [shape: f32[4,2,8,8], index: 6, kind: output, shape index: {1}]  }
   0x1   :  { %905 = sst [smem:[#allocation8_spill]] %s898_s0 }
   0x2   :  { %12 = vsyncpa [#allocation3], 0 }
   0x3   :  { %14 = vsyncpa [#allocation3 + $0x1], 0 }
   0x4   :  { %15 = vsyncpa [#allocation5], 0 }
   0x5   :  { %17 = vsyncpa [#allocation5 + $0x1], 0  ;;  %s756_s21 = smov 0   ;;  %s758_s22 = smov 0  }
   0x6   :  { %s760_s23 = smov 0   ;;  %s762_s24 = smov 0  }
   0x7 LB: > { %s777_s25 = sadd.s32 4294967295, %s717_s24   ;;  %s546_s26 = sadd.s32 4294967294, %s717_s24   ;;  %s717_s24 = sphi %s762_s24, %s912_s24   ;;  %s713_s23 = sphi %s760_s23, %s911_s23   ;;  %s709_s22 = sphi %s758_s22, %s910_s22   ;;  %s705_s21 = sphi %s756_s21, %s909_s21  }
   0x8   : > { %s781_s27 = sadd.s32 1, %s717_s24   ;;  %s155_s28 = sadd.s32 1, %s713_s23 }
   0x9   : > { %s152_s29 = ssub.s32 %s717_s24, %s781_s27  ;;  %p165_p0 = scmp.ne.s32.totalorder %s713_s23, %s709_s22 }
   0xa   : > { %p153_p1 = scmp.eq.s32.totalorder %s152_s29, 0  ;;  %p166_p2 = scmp.eq.s32.totalorder %s777_s25, 3 }
   0xb   : > { %p171_p3 = scmp.ne.s32.totalorder %s709_s22, %s705_s21  ;;  %p172_p4 = scmp.eq.s32.totalorder %s546_s26, 3 }
   0xc   : > { %s792_s30 = scalar_select %p153_p1, %s713_s23, %s155_s28  }
   0xd   : > { %p794_p5 = por %p166_p2, %p165_p0  ;;  %p798_p6 = por %p172_p4, %p171_p3 }
   0xe   : > { %p549_p7 = scmp.ge.s32.totalorder %s717_s24, 1  ;;  %p247_p8 = scmp.lt.s32.totalorder %s717_s24, 5 }
  0x10   : > { %p248_p9 = pnand %p549_p7, %p247_p8 }
  0x11   : > { %p293_p10 = scmp.lt.s32.totalorder (!%p248_p9), %s777_s25, 3  ;;  %s908_s0 = sld [smem:[#allocation8_spill]] (!%p248_p9) }
  0x12   : > { %251 = sbr.rel (%p248_p9) target bundleno = 185 (0xb9), region = 40  ;;  %s830_s14 = sand.u32 (!%p248_p9), 1, %s709_s22  }
  0x13   : > { %s550_s15 = sshll.u32 (!%p248_p9), %s830_s14, 4 }
  0x14   : > { %s285_s28 = scalar_lea.vmem (!%p248_p9), [#allocation2], %s550_s15 }
  0x15   : > { %s401_s29 = sshll.u32 (!%p248_p9), %s285_s28, 4  ;;  %s846_s29 = int_to_ptr.vmem [resolvable:$true] %s401_s29 }
  0x17   : > { %s806_s9 = scalar_select %p293_p10, %s777_s25, 3  ;;  %v310_v6 = vld [vmem:[%s908_s0 + $0x8] sm:$0xff]  ;;  %vm318_vm0 = vcmask 195584   ;;  %v309_v7 = vld [vmem:[%s908_s0] sm:$0xff]  ;;  %vm378_vm1 = vcmask 64512  }
  0x18   : > { %s384_s0 = scalar_lea.sflag [#allocation3], %s830_s14 }
  0x19   : > { %s574_s10 = smul.u32 24, %s806_s9  ;;  %s300_s13 = scalar_lea.vmem %s900_s2, %s806_s9 }
  0x1a   : > { %s308_s12 = scalar_lea.vmem %s902_s4, %s806_s9  ;;  %v621_v8 = vld [vmem:[%s300_s13] ss:$0 sm:$0xff] }
  0x1b   : > { %s297_s16 = scalar_lea.vmem %s899_s1, %s574_s10  ;;  %s305_s19 = scalar_lea.vmem %s901_s3, %s574_s10  ;;  %v622_v9 = vld [vmem:[%s308_s12] ss:$0 sm:$0xff] }
  0x1c   : > { %v313_v0 = vld [vmem:[%s297_s16 + $0x10] sm:$0xff]  ;;  %v312_v2 = vld [vmem:[%s297_s16 + $0x8] sm:$0xff]  ;;  %v311_v4 = vld [vmem:[%s297_s16] sm:$0xff]  ;;  %s566_s16 = sshll.u32 %s777_s25, 4  ;;  %s292_s10 = scalar_lea.vmem [#allocation4], %s550_s15 }
  0x1d   : > { %v350_v1 = vld [vmem:[%s305_s19 + $0x10] sm:$0xff]  ;;  %568 = vmatpush.msra.mxu2 %v313_v0  ;;  %v349_v3 = vld [vmem:[%s305_s19 + $0x8] sm:$0xff]  ;;  %v348_v5 = vld [vmem:[%s305_s19] sm:$0xff]  ;;  %338 = vmatpush.msra.mxu0 %v313_v0  ;;  %s400_s26 = scalar_lea.hbm %s903_s5, %s566_s16  ;;  %s418_s11 = sshll.u32 %s292_s10, 4  ;;  %s849_s11 = int_to_ptr.vmem [resolvable:$true] %s418_s11 }
  0x1e   : > { %571 = vmatpush.msra.mxu3 %v350_v1  ;;  %368 = vmatpush.msra.mxu1 %v350_v1  ;;  %s417_s9 = scalar_lea.hbm %s904_s6, %s566_s16  ;;  %s403_s13 = sshll.u32 %s400_s26, 4  ;;  %s404_s13 = int_to_ptr.hbm [resolvable:$true] %s403_s13 }
  0x1f   : > { %569 = vmatpush.msra.mxu2 %v312_v2  ;;  %339 = vmatpush.msra.mxu0 %v312_v2  ;;  %s420_s12 = sshll.u32 %s417_s9, 4  ;;  %s637_s15 = sshra.s32 %s404_s13, 4  ;;  %s852_s12 = int_to_ptr.hbm [resolvable:$true] %s420_s12  ;;  %s638_s15 = int_to_ptr.hbm [resolvable:$true] %s637_s15 }
  0x20   : > { %572 = vmatpush.msra.mxu3 %v349_v3  ;;  %369 = vmatpush.msra.mxu1 %v349_v3  ;;  %s639_s16 = scalar_lea.hbm %s638_s15, 16  ;;  %s643_s19 = scalar_lea.hbm %s903_s5, 64 }
  0x21   : > { %570 = vmatpush.msra.mxu2 %v311_v4  ;;  %340 = vmatpush.msra.mxu0 %v311_v4  ;;  %p640_p11 = scmp.ne.s32.totalorder %s638_s15, %s639_s16  ;;  %p644_p0 = scmp.lt.s32.totalorder %s638_s15, %s903_s5 }
  0x22   : > { %573 = vmatpush.msra.mxu3 %v348_v5  ;;  %555 = vmatmul.msk.f32.vlgmr.msra.gmra.mxu2 %vm318_vm0, %v310_v6  ;;  %p645_p1 = scmp.lt.s32.totalorder %s643_s19, %s639_s16 }
  0x23   : > { %557 = vmatmul.msk.f32.vlgmr.msra.gmra.mxu3 %vm318_vm0, %v310_v6  ;;  %370 = vmatpush.msra.mxu1 %v348_v5  ;;  %p641_p12 = pnand %p640_p11, %p794_p5 }
  0x24   : > { %554 = vmatmul.msk.f32.vlgmr.msra.gmra.mxu0 %vm318_vm0, %v309_v7  ;;  %556 = vmatmul.msk.f32.vlgmr.msra.gmra.mxu1 %vm318_vm0, %v309_v7  ;;  %p646_p2 = por %p645_p1, %p644_p0 }
  0x25   : > { %p642_p13 = pneg %p641_p12 }
  0x27   : > { %p647_p3 = pnand %p646_p2, %p642_p13 }
  0xa1   : > { %v342_v10 = vpop.f32.mrf.mxu0  ;;  %v372_v11 = vpop.f32.mrf.mxu1 }
  0xa2   : > { %v343_v12 = vadd.f32 %v621_v8, %v342_v10  ;;  %v373_v13 = vadd.f32 %v622_v9, %v372_v11 }
  0xa4   : > { %379 = vst.msk [vmem:[%s285_s28] sm:$0xff] %vm378_vm1, %v343_v12 }
  0xa5   : > { %v345_v14 = vpop.f32.mrf.mxu2  ;;  %381 = vst.msk [vmem:[%s292_s10] sm:$0xff] %vm378_vm1, %v373_v13 }
  0xa6   : > { %v375_v15 = vpop.f32.mrf.mxu3  ;;  %v346_v16 = vadd.f32 %v621_v8, %v345_v14 }
  0xa7   : > { %v376_v17 = vadd.f32 %v622_v9, %v375_v15 }
  0xa8   : > { %380 = vst.msk [vmem:[%s285_s28 + $0x8] sm:$0xff] %vm378_vm1, %v346_v16 }
  0xa9   : > { %382 = vst.msk [vmem:[%s292_s10 + $0x8] sm:$0xff] %vm378_vm1, %v376_v17 }
  0xaa   : > { %650 = shalt.err (!%p647_p3)
}
  0xab   : > { %s719_s28 = smov 128   ;;  %s720_s10 = smov 8  }
  0xac   : > { %575 = dma.vmem_to_hbm [thread:$0]  (%p794_p5), %s846_s29, 256, %s404_s13, %s384_s0, %s719_s28, %s719_s28, %s720_s10  }
  0xad   : > { %s389_s25 = scalar_lea.sflag [#allocation5], %s830_s14  ;;  %s665_s9 = sshra.s32 %s852_s12, 4  ;;  %s666_s9 = int_to_ptr.hbm [resolvable:$true] %s665_s9 }
  0xae   : > { %s667_s17 = scalar_lea.hbm %s666_s9, 16  ;;  %s671_s18 = scalar_lea.hbm %s904_s6, 64 }
  0xaf   : > { %p668_p4 = scmp.ne.s32.totalorder %s666_s9, %s667_s17  ;;  %p672_p9 = scmp.lt.s32.totalorder %s666_s9, %s904_s6 }
  0xb0   : > { %p673_p10 = scmp.lt.s32.totalorder %s671_s18, %s667_s17 }
  0xb1   : > { %p669_p7 = pnand %p668_p4, %p794_p5 }
  0xb2   : > { %p674_p11 = por %p673_p10, %p672_p9 }
  0xb3   : > { %p670_p8 = pneg %p669_p7 }
  0xb5   : > { %p675_p12 = pnand %p674_p11, %p670_p8 }
  0xb7   : > { %678 = shalt.err (!%p675_p12)
}
  0xb8   : > { %576 = dma.vmem_to_hbm [thread:$0]  (%p794_p5), %s849_s11, 256, %s852_s12, %s389_s25, %s719_s28, %s719_s28, %s720_s10  }
  0xb9 PF: > { %p586_p13 = scmp.ge.s32.totalorder %s717_s24, 2  ;;  %s435_s14 = sand.u32 1, %s705_s21  }
  0xba   : > { %s436_s29 = scalar_lea.sflag [#allocation3], %s435_s14 }
  0xbb   : > { %p580_p0 = pnand %p586_p13, %p798_p6 }
  0xbd   : > { %p581_p1 = pneg %p580_p0 }
  0xbf   : > { %696 = dma.done.wait (%p581_p1), %s436_s29, 256  }
  0xc0   : > { %698 = vsyncadd (%p581_p1), %s436_s29, 4294967040  ;;  %s446_s13 = scalar_lea.sflag [#allocation5], %s435_s14 }
  0xc1   : > { %700 = dma.done.wait (%p581_p1), %s446_s13, 256  }
  0xc2   : > { %702 = vsyncadd (%p581_p1), %s446_s13, 4294967040  ;;  %p20_p5 = scmp.ge.s32.totalorder %s781_s27, 6   ;;  %s909_s21 = smov %s709_s22 }
  0xc3   : > { %s910_s22 = smov %s713_s23  ;;  %s911_s23 = smov %s792_s30 }
  0xc4   : > { %s912_s24 = smov %s781_s27  ;;  %22 = sbr.rel (!%p20_p5) target bundleno = 7 (0x7), region = 101 }
  0xc9   :  { %452 = vsyncpa [#allocation3], 1 }
  0xca   :  { %454 = vsyncpa [#allocation3 + $0x1], 1 }
  0xcb   :  { %455 = vsyncpa [#allocation5], 1 }
  0xcc   :  { %457 = vsyncpa [#allocation5 + $0x1], 1 }

</bundles_post_ra>
